<compile_context>
chip_gen: v7x
topology: tpu7x:2x2x1
jax: 0.10.0
libtpu: 0.0.40
codegen_flags: <defaults>
</compile_context>

<pallas_src>
import jax
import jax.numpy as jnp
from jax.experimental import pallas as pl
from jax.experimental.pallas import tpu as pltpu

LANES = 128
MAX_BLOCK_ROWS = 2048   # 2048 x 128 f32 = 1 MiB per buffer; x3 streams x2 bufs ≈ 6 MiB


def _round_up(x: int, m: int) -> int:
    return (x + m - 1) // m * m


def _tiling(total: int, dtype) -> tuple[int, int]:
    """Pick (block_rows, rows_padded) for a flat array of `total` elements."""
    itemsize = jnp.dtype(dtype).itemsize
    row_align = max(8, 32 // itemsize)          # 8 rows f32, 16 bf16, 32 int8
    rows = pl.cdiv(total, LANES)
    if rows <= MAX_BLOCK_ROWS:
        block_rows = _round_up(rows, row_align)
    else:
        n_blocks = pl.cdiv(rows, MAX_BLOCK_ROWS)
        block_rows = _round_up(pl.cdiv(rows, n_blocks), row_align)
    rows_padded = _round_up(rows, block_rows)
    return block_rows, rows_padded


def _noise_kernel(scale_ref, x_ref, eps_ref, o_ref):
    """zt_tile = sqrt(a) * x0_tile + sqrt(1-a) * eps_tile.

    scale_ref : SMEM f32[2]            [sqrt(alpha_bar[t]), sqrt(1 - alpha_bar[t])]
    x_ref     : VMEM dtype[bm, 128]    clean input tile (native dtype)
    eps_ref   : VMEM dtype[bm, 128]    pre-drawn N(0,1) tile (native dtype)
    o_ref     : VMEM dtype[bm, 128]    noisy output tile (native dtype)
    """
    x = x_ref[...].astype(jnp.float32)
    eps = eps_ref[...].astype(jnp.float32)
    o_ref[...] = (scale_ref[0] * x + scale_ref[1] * eps).astype(o_ref.dtype)


def make_alpha_schedule(n_timesteps: int,
                        beta_min: float = 1e-4,
                        beta_max: float = 2e-2) -> jnp.ndarray:
    """BetaSchedule (linear) + AlphaSchedule (cumprod of 1 - beta)."""
    betas = jnp.linspace(beta_min, beta_max, n_timesteps, dtype=jnp.float32)
    return jnp.cumprod(1.0 - betas)


def _markov_chain_sample_impl(x0, alpha_sched, t, key):
    """zt = sqrt(alpha_bar[t]) * x0 + sqrt(1 - alpha_bar[t]) * eps  (Pallas kernel)."""
    orig_shape = x0.shape
    dtype = x0.dtype
    total = x0.size

    block_rows, rows_padded = _tiling(total, dtype)
    grid = (rows_padded // block_rows,)

    # Flatten to a lane-dense (rows_padded, 128) slab; pad tail with zeros.
    flat = x0.reshape(-1)
    pad = rows_padded * LANES - total
    if pad:
        flat = jnp.pad(flat, (0, pad))
    x2d = flat.reshape(rows_padded, LANES)

    # eps = randn_like(x0): drawn in x0's dtype directly at the padded slab
    # shape, so it streams straight into the kernel with no extra reshape pass.
    eps2d = jax.random.normal(key, (rows_padded, LANES), dtype=dtype)

    # Hoisted scalar prep: one gather + two sqrts, done once in XLA.
    alpha = alpha_sched.astype(jnp.float32)[t]
    scales = jnp.stack([jnp.sqrt(alpha), jnp.sqrt(1.0 - alpha)])

    # Single-block toy grid: nothing to shard across TCs -> "arbitrary".
    sem = ("parallel",) if grid[0] > 1 else ("arbitrary",)

    out2d = pl.pallas_call(
        _noise_kernel,
        out_shape=jax.ShapeDtypeStruct((rows_padded, LANES), dtype),
        grid_spec=pltpu.PrefetchScalarGridSpec(
            num_scalar_prefetch=0,
            grid=grid,
            in_specs=[
                # [sqrt(a), sqrt(1-a)] live whole in SMEM (scalar reads).
                pl.BlockSpec(memory_space=pltpu.MemorySpace.SMEM),
                pl.BlockSpec((block_rows, LANES), lambda i: (i, 0)),
                pl.BlockSpec((block_rows, LANES), lambda i: (i, 0)),
            ],
            out_specs=pl.BlockSpec((block_rows, LANES), lambda i: (i, 0)),
        ),
        compiler_params=pltpu.CompilerParams(dimension_semantics=sem),
        # eps2d is a fresh temporary created inside this jit and dead after the
        # call -> aliasing it to the output is a true donation (no extra output
        # allocation, no copy-insertion). Block i of eps is fully read before
        # block i of the output is written.
        input_output_aliases={2: 0},
    )(scales, x2d, eps2d)

    zt = out2d.reshape(-1)
    if pad:
        zt = zt[:total]
    return zt.reshape(orig_shape)


markov_chain_sample = jax.jit(_markov_chain_sample_impl)


if __name__ == "__main__":
    n_timesteps = 200

    key = jax.random.PRNGKey(0)
    k_x, k_t, k_eps = jax.random.split(key, 3)

    # x0: NCHW, small shapes
    x0 = jax.random.normal(k_x, (2, 4, 16, 16), dtype=jnp.float32)

    # timestep_sampler = cc.RandInt(n_timesteps - 1).
    # TODO(synk): confirm whether cc.RandInt(n-1) includes n-1; we sample [0, n-2].
    t = jax.random.randint(k_t, (), 0, n_timesteps - 1)

    alpha_sched = make_alpha_schedule(n_timesteps)

    zt = jax.block_until_ready(markov_chain_sample(x0, alpha_sched, t, k_eps))

    # ---- correctness checks against a pure-JAX reference ----
    block_rows, rows_padded = _tiling(x0.size, x0.dtype)
    eps_ref = jax.random.normal(k_eps, (rows_padded, LANES), dtype=x0.dtype)
    eps_ref = eps_ref.reshape(-1)[: x0.size].reshape(x0.shape)
    alpha = alpha_sched[t]
    zt_ref = jnp.sqrt(alpha) * x0 + jnp.sqrt(1.0 - alpha) * eps_ref

    assert zt.shape == x0.shape and zt.dtype == x0.dtype
    assert jnp.allclose(zt, zt_ref, atol=1e-5, rtol=1e-5), "kernel mismatch vs reference"

    # Recovered noise should look standard normal (2048 samples -> wide margins).
    eps_est = (zt - jnp.sqrt(alpha) * x0) / jnp.sqrt(1.0 - alpha)
    assert bool(jnp.isfinite(eps_est).all())
    assert float(jnp.abs(eps_est.mean())) < 0.15, f"noise mean off: {eps_est.mean()}"
    assert 0.8 < float(eps_est.std()) < 1.2, f"noise std off: {eps_est.std()}"

    # Determinism: same key -> same draw.
    zt2 = jax.block_until_ready(markov_chain_sample(x0, alpha_sched, t, k_eps))
    assert bool(jnp.array_equal(zt, zt2))

    print("KERNEL_OK")
</pallas_src>

<mosaic_0001>
module attributes {stable_mosaic.version = 11 : i64} {
  func.func @_noise_kernel(%arg0: i32, %arg1: memref<2xf32, #tpu.memory_space<smem>>, %arg2: memref<16x128xf32, #tpu.memory_space<vmem>>, %arg3: memref<16x128xf32, #tpu.memory_space<vmem>>, %arg4: memref<16x128xf32, #tpu.memory_space<vmem>>) attributes {dimension_semantics = [#tpu.dimension_semantics<arbitrary>], iteration_bounds = array<i64: 1>, scalar_prefetch = 0 : i64, scratch_operands = 0 : i64, tpu.core_type = #tpu.core_type<tc>, window_params = [{transform_indices = @transform_0, window_bounds = array<i64: 2>}, {transform_indices = @transform_1, window_bounds = array<i64: 16, 128>}, {transform_indices = @transform_2, window_bounds = array<i64: 16, 128>}, {transform_indices = @transform_3, window_bounds = array<i64: 16, 128>}]} {
    %c0 = arith.constant 0 : index
    %c0_0 = arith.constant 0 : index
    %0 = vector.load %arg2[%c0, %c0_0] : memref<16x128xf32, #tpu.memory_space<vmem>>, vector<16x128xf32>
    %c0_1 = arith.constant 0 : index
    %c0_2 = arith.constant 0 : index
    %1 = vector.load %arg3[%c0_1, %c0_2] : memref<16x128xf32, #tpu.memory_space<vmem>>, vector<16x128xf32>
    %c0_3 = arith.constant 0 : index
    %2 = memref.load %arg1[%c0_3] : memref<2xf32, #tpu.memory_space<smem>>
    %3 = vector.broadcast %2 : f32 to vector<16x128xf32>
    %4 = arith.mulf %3, %0 : vector<16x128xf32>
    %c1 = arith.constant 1 : index
    %5 = memref.load %arg1[%c1] : memref<2xf32, #tpu.memory_space<smem>>
    %6 = vector.broadcast %5 : f32 to vector<16x128xf32>
    %7 = arith.mulf %6, %1 : vector<16x128xf32>
    %8 = arith.addf %4, %7 : vector<16x128xf32>
    %c0_4 = arith.constant 0 : index
    %c0_5 = arith.constant 0 : index
    %9 = vector.load %arg4[%c0_4, %c0_5] : memref<16x128xf32, #tpu.memory_space<vmem>>, vector<16x128xf32>
    tpu.vector_store %arg4[%c0_4, %c0_5], %8 {strides = array<i32>} : memref<16x128xf32, #tpu.memory_space<vmem>>, vector<16x128xf32>,
    return
  }
  func.func @transform_0(%arg0: i32) -> i32 {
    %c0_i32 = arith.constant 0 : i32
    %c0_i32_0 = arith.constant 0 : i32
    return %c0_i32 : i32
  }
  func.func @transform_1(%arg0: i32) -> (i32, i32) {
    %c0_i32 = arith.constant 0 : i32
    %c0_i32_0 = arith.constant 0 : i32
    return %arg0, %c0_i32 : i32, i32
  }
  func.func @transform_2(%arg0: i32) -> (i32, i32) {
    %c0_i32 = arith.constant 0 : i32
    %c0_i32_0 = arith.constant 0 : i32
    return %arg0, %c0_i32 : i32, i32
  }
  func.func @transform_3(%arg0: i32) -> (i32, i32) {
    %c0_i32 = arith.constant 0 : i32
    %c0_i32_0 = arith.constant 0 : i32
    return %arg0, %c0_i32 : i32, i32
  }
}

</mosaic_0001>

<bundles_post_ra>
// kernel: _markov_chain_sample_impl.1
= control target key start
LH: loop header
LB: loop body
LE: loop exit
PB: predicated region body
PF: predicated region fallthrough
CT: control target
= control target key end

     0   :  { %8 = vsyncpa [#allocation3], 0  ;;  %s106_s0 = inlined_call_operand.vmem [shape: f32[2], index: 0, kind: input, shape index: {}]   ;;  %s107_s1 = inlined_call_operand.vmem [shape: f32[16,128], index: 1, kind: input, shape index: {}]   ;;  %s108_s2 = inlined_call_operand.vmem [shape: f32[16,128], index: 2, kind: input, shape index: {}, may-alias: {2,3}]   ;;  %s109_s3 = inlined_call_operand.vmem [shape: f32[16,128], index: 3, kind: output, shape index: {}, may-alias: {2,3}]  }
   0x1   :  { %s15_s14 = sshll.u32 %s106_s0, 4  ;;  %s16_s14 = int_to_ptr.vmem [resolvable:$true] %s15_s14 }
   0x2   :  { %s50_s15 = scalar_lea.vmem %s16_s14, 16  ;;  %p55_p1 = scmp.lt.s32.totalorder %s16_s14, %s16_s14 }
   0x3   :  { %p51_p0 = scmp.ne.s32.totalorder %s16_s14, %s50_s15  ;;  %p56_p2 = scmp.lt.s32.totalorder %s50_s15, %s50_s15 }
   0x5   :  { %p57_p3 = por %p56_p2, %p55_p1 }
   0x7   :  { %p58_p4 = pnand %p57_p3, %p51_p0 }
   0x9   :  { %61 = shalt.err (!%p58_p4)
}
   0xa   :  { %s64_s16 = smov [#allocation2]  }
   0xb   :  { %18 = dma.vmem_to_smem %s16_s14, 16, %s64_s16, [#allocation3]  }
   0xc   :  { %62 = dma.done.wait [#allocation3], 16  }
   0xd   :  { %63 = vsyncadd [#allocation3], 4294967280 }
   0xe   :  { %26 = sfence }
   0xf   :  { %s31_s17 = sld [smem:[#allocation2]]  ;;  %s48_s18 = sld [smem:[#allocation2 + $0x1]]  ;;  %v27_v0 = vld [vmem:[%s107_s1] sm:$0xff]  ;;  %v28_v2 = vld [vmem:[%s107_s1 + $0x8] sm:$0xff] }
  0x10   :  { %v29_v1 = vld [vmem:[%s108_s2] sm:$0xff]  ;;  %v30_v3 = vld [vmem:[%s108_s2 + $0x8] sm:$0xff] }
  0x15   :  { %v32_v4 = vstv %s31_s17  ;;  %v36_v5 = vstv %s48_s18 }
  0x16   :  { %v33_v6 = vmul.f32 %v32_v4, %v27_v0  ;;  %v37_v7 = vmul.f32 %v36_v5, %v29_v1  ;;  %v34_v8 = vmul.f32 %v32_v4, %v28_v2  ;;  %v38_v9 = vmul.f32 %v36_v5, %v30_v3 }
  0x18   :  { %v39_v10 = vadd.f32 %v37_v7, %v33_v6  ;;  %v40_v11 = vadd.f32 %v38_v9, %v34_v8 }
  0x1a   :  { %41 = vst [vmem:[%s109_s3] sm:$0xff] %v39_v10  ;;  %42 = vst [vmem:[%s109_s3 + $0x8] sm:$0xff] %v40_v11 }
  0x1b   :  { %47 = vsyncpa [#allocation3], 1 }

</bundles_post_ra>
